<compile_context>
chip_gen: v6e
topology: v6e:2x2x1
jax: 0.10.0
libtpu: 0.0.40
codegen_flags: <defaults>
</compile_context>

<pallas_src>
import functools

import jax
import jax.numpy as jnp
from jax.experimental import pallas as pl
from jax.experimental.pallas import tpu as pltpu

STATE_DIM = 8
HIDDEN = 128
N_ACTIONS = 4
OUT_ROWS = 8                    # probs rows 0..3, value row 4, rows 5..7 pad

PARAM_ROWS = 152                # 16 (W1 + b1 + pad) + 128 (W_head) + 1 (b_head) + 7 pad
_B1_ROW = STATE_DIM             # 8
_HEAD_W_ROW = 16
_HEAD_B_ROW = _HEAD_W_ROW + HIDDEN   # 144


def _round_up(n, m):
    return ((n + m - 1) // m) * m


def _actor_critic_kernel(x_ref, p_ref, out_ref):
    # x: (TB, 8) raw states.
    x = x_ref[...]

    # Encoder: Linear(8, 128) + ReLU.
    w1 = p_ref[0:STATE_DIM, :]                                 # (8, 128)
    b1 = p_ref[_B1_ROW:_B1_ROW + 1, :]                         # (1, 128)
    h = jnp.dot(x, w1, preferred_element_type=jnp.float32) + b1
    h = jnp.maximum(h, 0.0)

    # Fused heads: one (TB,128)x(128,128) matmul; lanes 0..3 = action logits,
    # lane 4 = state value, lanes 5..127 = 0 (zero weight columns).
    w_head = p_ref[_HEAD_W_ROW:_HEAD_W_ROW + HIDDEN, :]        # (128, 128)
    b_head = p_ref[_HEAD_B_ROW:_HEAD_B_ROW + 1, :]             # (1, 128)
    head = jnp.dot(h, w_head, preferred_element_type=jnp.float32) + b_head

    # Exact softmax over the 4 action lanes (masked, full-width on the VPU).
    lane = jax.lax.broadcasted_iota(jnp.int32, head.shape, dimension=1)
    logits = jnp.where(lane < N_ACTIONS, head, -1e30)
    m = jnp.max(logits, axis=-1, keepdims=True)
    e = jnp.exp(logits - m)                                    # padded lanes -> 0
    denom = jnp.sum(e, axis=-1, keepdims=True)
    probs = e / denom

    # Lanes 0..3 = probs, lane 4 = value, rest = 0; transpose to a compact
    # lane-dense (8, TB) output slab (16x fewer HBM store bytes).
    res = jnp.where(lane == N_ACTIONS, head, probs)            # (TB, 128)
    out_ref[...] = jnp.transpose(res)[0:OUT_ROWS, :]           # (8, TB)


def pack_params(params):
    """Fuse (w1, b1, wa, ba, wv, bv) into one (152, 128) f32 buffer."""
    w1, b1, wa, ba, wv, bv = params
    w1_blk = jnp.zeros((_HEAD_W_ROW, HIDDEN), jnp.float32)
    w1_blk = w1_blk.at[0:STATE_DIM, :].set(w1)
    w1_blk = w1_blk.at[_B1_ROW, :].set(b1.reshape(HIDDEN))

    w_head = jnp.zeros((HIDDEN, HIDDEN), jnp.float32)
    w_head = w_head.at[:, 0:N_ACTIONS].set(wa)
    w_head = w_head.at[:, N_ACTIONS].set(wv.reshape(HIDDEN))

    b_head = jnp.zeros((1, HIDDEN), jnp.float32)
    b_head = b_head.at[0, 0:N_ACTIONS].set(ba.reshape(N_ACTIONS))
    b_head = b_head.at[0, N_ACTIONS].set(bv.reshape(()))

    tail = jnp.zeros((PARAM_ROWS - _HEAD_B_ROW - 1, HIDDEN), jnp.float32)
    return jnp.concatenate([w1_blk, w_head, b_head, tail], axis=0)


@functools.partial(jax.jit, static_argnames=("block_b",))
def actor_critic_forward(x, packed_params, *, block_b=512):
    """x: (8,) single state or (B, 8) batch of states.

    Returns (action_probs, state_value):
      (4,), (1,)        for a single state,
      (B, 4), (B, 1)    for a batch.
    """
    single = (x.ndim == 1)
    x2 = x.reshape(-1, STATE_DIM).astype(jnp.float32)
    B = x2.shape[0]

    # Batch tiling:
    #   * small batch (< 256 padded rows): single tile, block == full extent.
    #   * otherwise: >= 2 grid steps (v7x has 2 TCs), tile a multiple of 128
    #     so the transposed output block's last dim satisfies the lane rule.
    Bp0 = _round_up(B, 8)
    if Bp0 <= block_b and Bp0 < 256:
        TB = Bp0
    else:
        cap = max(128, (block_b // 128) * 128)
        TB = min(cap, max(128, _round_up((Bp0 + 1) // 2, 128)))
    Bp = _round_up(Bp0, TB)

    x_pad = x2 if Bp == B else jnp.pad(x2, ((0, Bp - B), (0, 0)))

    out = pl.pallas_call(
        _actor_critic_kernel,
        out_shape=jax.ShapeDtypeStruct((OUT_ROWS, Bp), jnp.float32),
        grid=(Bp // TB,),
        in_specs=[
            pl.BlockSpec((TB, STATE_DIM), lambda i: (i, 0)),
            pl.BlockSpec((PARAM_ROWS, HIDDEN), lambda i: (0, 0)),  # weights resident
        ],
        out_specs=pl.BlockSpec((OUT_ROWS, TB), lambda i: (0, i)),
        compiler_params=pltpu.CompilerParams(
            dimension_semantics=("parallel",)),
    )(x_pad, packed_params)

    probs = jnp.transpose(out[0:N_ACTIONS, :B])
    value = jnp.transpose(out[N_ACTIONS:N_ACTIONS + 1, :B])
    if single:
        return probs[0], value[0]
    return probs, value


def init_params(key):
    """Deterministic init mimicking nn.Linear default (uniform +-1/sqrt(fan_in))."""
    ks = jax.random.split(key, 6)

    def lin(kw, kb, fan_in, fan_out):
        bound = 1.0 / jnp.sqrt(float(fan_in))
        w = jax.random.uniform(kw, (fan_in, fan_out), jnp.float32, -bound, bound)
        b = jax.random.uniform(kb, (1, fan_out), jnp.float32, -bound, bound)
        return w, b

    w1, b1 = lin(ks[0], ks[1], STATE_DIM, HIDDEN)
    wa, ba = lin(ks[2], ks[3], HIDDEN, N_ACTIONS)
    wv, bv = lin(ks[4], ks[5], HIDDEN, 1)
    return (w1, b1, wa, ba, wv, bv)


def _reference_forward(x2, params):
    """Pure-JAX reference of the PyTorch forward (batched rows)."""
    w1, b1, wa, ba, wv, bv = params
    h = jnp.maximum(x2 @ w1 + b1, 0.0)
    value = h @ wv + bv
    probs = jax.nn.softmax(h @ wa + ba, axis=-1)
    return probs, value


if __name__ == "__main__":
    key = jax.random.PRNGKey(0)
    pkey, xkey, x2key, skey = jax.random.split(key, 4)

    params = init_params(pkey)
    packed = pack_params(params)

    # Small batch of env states.
    B = 8
    xb = jax.random.normal(xkey, (B, STATE_DIM), jnp.float32)

    probs, value = actor_critic_forward(xb, packed)
    probs = jax.block_until_ready(probs)
    value = jax.block_until_ready(value)

    ref_probs, ref_value = _reference_forward(xb, params)
    assert probs.shape == (B, N_ACTIONS) and value.shape == (B, 1)
    assert jnp.allclose(probs, ref_probs, atol=2e-3, rtol=2e-3)
    assert jnp.allclose(value, ref_value, atol=2e-3, rtol=2e-3)
    assert jnp.all(jnp.abs(jnp.sum(probs, axis=-1) - 1.0) < 1e-5)

    # Larger batch exercising multi-tile grid (2 parallel steps) + row padding.
    B2 = 272
    xb2 = jax.random.normal(x2key, (B2, STATE_DIM), jnp.float32)
    probs2, value2 = actor_critic_forward(xb2, packed)
    probs2 = jax.block_until_ready(probs2)
    ref_probs2, ref_value2 = _reference_forward(xb2, params)
    assert probs2.shape == (B2, N_ACTIONS) and value2.shape == (B2, 1)
    assert jnp.allclose(probs2, ref_probs2, atol=2e-3, rtol=2e-3)
    assert jnp.allclose(value2, ref_value2, atol=2e-3, rtol=2e-3)

    # Single-state path (matches PyTorch forward's (8,) input contract).
    probs1, value1 = actor_critic_forward(xb[0], packed)
    probs1 = jax.block_until_ready(probs1)
    assert probs1.shape == (N_ACTIONS,) and value1.shape == (1,)
    assert jnp.allclose(probs1, ref_probs[0], atol=2e-3, rtol=2e-3)

    # TODO(synk): Categorical sampling / RL bookkeeping (logprobs, rewards,
    # compute_loss) stay host-side glue outside the kernel hot path.
    action = int(jax.random.categorical(skey, jnp.log(probs1)))
    assert 0 <= action < N_ACTIONS

    print("KERNEL_OK")
</pallas_src>

<mosaic_0001>
module attributes {stable_mosaic.version = 11 : i64} {
  func.func @_actor_critic_kernel(%arg0: i32, %arg1: memref<8x8xf32, #tpu.memory_space<vmem>>, %arg2: memref<152x128xf32, #tpu.memory_space<vmem>>, %arg3: memref<8x8xf32, #tpu.memory_space<vmem>>) attributes {dimension_semantics = [#tpu.dimension_semantics<parallel>], iteration_bounds = array<i64: 1>, scalar_prefetch = 0 : i64, scratch_operands = 0 : i64, tpu.core_type = #tpu.core_type<tc>, window_params = [{transform_indices = @transform_0, window_bounds = array<i64: 8, 8>}, {pipeline_mode = #tpu.pipeline_mode<synchronous>, transform_indices = @transform_1, window_bounds = array<i64: 152, 128>}, {transform_indices = @transform_2, window_bounds = array<i64: 8, 8>}]} {
    %c0 = arith.constant 0 : index
    %c0_0 = arith.constant 0 : index
    %0 = vector.load %arg1[%c0, %c0_0] : memref<8x8xf32, #tpu.memory_space<vmem>>, vector<8x8xf32>
    %c0_1 = arith.constant 0 : index
    %c0_2 = arith.constant 0 : index
    %1 = vector.load %arg2[%c0_1, %c0_2] : memref<152x128xf32, #tpu.memory_space<vmem>>, vector<8x128xf32>
    %c8 = arith.constant 8 : index
    %c0_3 = arith.constant 0 : index
    %2 = vector.load %arg2[%c8, %c0_3] : memref<152x128xf32, #tpu.memory_space<vmem>>, vector<1x128xf32>
    %cst = arith.constant dense<0.000000e+00> : vector<8x128xf32>
    %3 = tpu.matmul %0, %1, %cst {dimension_numbers = #tpu.dot_dimension_numbers<[1], [0], [0], [1], [0, 0, 1, 1], [], []>} : vector<8x8xf32>, vector<8x128xf32>, vector<8x128xf32> -> vector<8x128xf32>
    %4 = vector.broadcast %2 : vector<1x128xf32> to vector<8x128xf32>
    %5 = arith.addf %3, %4 : vector<8x128xf32>
    %cst_4 = arith.constant 0.000000e+00 : f32
    %6 = vector.broadcast %cst_4 : f32 to vector<8x128xf32>
    %7 = arith.maximumf %5, %6 : vector<8x128xf32>
    %c16 = arith.constant 16 : index
    %c0_5 = arith.constant 0 : index
    %8 = vector.load %arg2[%c16, %c0_5] : memref<152x128xf32, #tpu.memory_space<vmem>>, vector<128x128xf32>
    %c144 = arith.constant 144 : index
    %c0_6 = arith.constant 0 : index
    %9 = vector.load %arg2[%c144, %c0_6] : memref<152x128xf32, #tpu.memory_space<vmem>>, vector<1x128xf32>
    %cst_7 = arith.constant dense<0.000000e+00> : vector<8x128xf32>
    %10 = tpu.matmul %7, %8, %cst_7 {dimension_numbers = #tpu.dot_dimension_numbers<[1], [0], [0], [1], [0, 0, 1, 1], [], []>} : vector<8x128xf32>, vector<128x128xf32>, vector<8x128xf32> -> vector<8x128xf32>
    %11 = vector.broadcast %9 : vector<1x128xf32> to vector<8x128xf32>
    %12 = arith.addf %10, %11 : vector<8x128xf32>
    %13 = tpu.iota {dimensions = array<i32: 1>} : vector<8x128xi32>
    %c4_i32 = arith.constant 4 : i32
    %14 = vector.broadcast %c4_i32 : i32 to vector<8x128xi32>
    %15 = arith.cmpi slt, %13, %14 : vector<8x128xi32>
    %cst_8 = arith.constant -1.000000e+30 : f32
    %16 = vector.broadcast %cst_8 : f32 to vector<8x128xf32>
    %17 = arith.select %15, %12, %16 : vector<8x128xi1>, vector<8x128xf32>
    %cst_9 = arith.constant dense<0xFF800000> : vector<8xf32>
    %18 = vector.multi_reduction <maximumf>, %17, %cst_9 [1] : vector<8x128xf32> to vector<8xf32>
    %19 = vector.shape_cast %18 : vector<8xf32> to vector<8x1xf32>
    %20 = vector.broadcast %19 : vector<8x1xf32> to vector<8x128xf32>
    %21 = arith.subf %17, %20 : vector<8x128xf32>
    %22 = math.exp %21 : vector<8x128xf32>
    %cst_10 = arith.constant dense<0.000000e+00> : vector<8xf32>
    %23 = vector.multi_reduction <add>, %22, %cst_10 [1] : vector<8x128xf32> to vector<8xf32>
    %24 = vector.shape_cast %23 : vector<8xf32> to vector<8x1xf32>
    %25 = vector.broadcast %24 : vector<8x1xf32> to vector<8x128xf32>
    %26 = arith.divf %22, %25 : vector<8x128xf32>
    %c4_i32_11 = arith.constant 4 : i32
    %27 = vector.broadcast %c4_i32_11 : i32 to vector<8x128xi32>
    %28 = arith.cmpi eq, %13, %27 : vector<8x128xi32>
    %29 = arith.select %28, %12, %26 : vector<8x128xi1>, vector<8x128xf32>
    %30 = tpu.transpose %29, [1, 0] : vector<8x128xf32> -> vector<128x8xf32>
    %31 = vector.extract_strided_slice %30 {offsets = [0, 0], sizes = [8, 8], strides = [1, 1]} : vector<128x8xf32> to vector<8x8xf32>
    %c0_12 = arith.constant 0 : index
    %c0_13 = arith.constant 0 : index
    %32 = vector.load %arg3[%c0_12, %c0_13] : memref<8x8xf32, #tpu.memory_space<vmem>>, vector<8x8xf32>
    tpu.vector_store %arg3[%c0_12, %c0_13], %31 {strides = array<i32>} : memref<8x8xf32, #tpu.memory_space<vmem>>, vector<8x8xf32>,
    return
  }
  func.func @transform_0(%arg0: i32) -> (i32, i32) {
    %c0_i32 = arith.constant 0 : i32
    %c0_i32_0 = arith.constant 0 : i32
    return %arg0, %c0_i32 : i32, i32
  }
  func.func @transform_1(%arg0: i32) -> (i32, i32) {
    %c0_i32 = arith.constant 0 : i32
    %c0_i32_0 = arith.constant 0 : i32
    %c0_i32_1 = arith.constant 0 : i32
    return %c0_i32, %c0_i32_0 : i32, i32
  }
  func.func @transform_2(%arg0: i32) -> (i32, i32) {
    %c0_i32 = arith.constant 0 : i32
    %c0_i32_0 = arith.constant 0 : i32
    return %c0_i32, %arg0 : i32, i32
  }
}

</mosaic_0001>

<bundles_post_ra>
// kernel: actor_critic_forward.1
= control target key start
LH: loop header
LB: loop body
LE: loop exit
PB: predicated region body
PF: predicated region fallthrough
CT: control target
= control target key end

     0   :  { %7 = vsyncpa [#allocation3], 0  ;;  %s412_s0 = inlined_call_operand.hbm [shape: f32[8,8], index: 0, kind: input, shape index: {}]   ;;  %s413_s1 = inlined_call_operand.hbm [shape: f32[152,128], index: 1, kind: input, shape index: {}]   ;;  %s414_s2 = inlined_call_operand.vmem [shape: f32[8,8], index: 2, kind: output, shape index: {}]  }
   0x1   :  { %8 = vsyncpa [#allocation5], 0  ;;  %s380_s9 = smov [#allocation2]   ;;  %s381_s11 = smov [#allocation4]  }
   0x2   :  { %s15_s10 = sshll.u32 %s380_s9, 4  ;;  %s24_s12 = sshll.u32 %s381_s11, 4  ;;  %s16_s10 = int_to_ptr.vmem [resolvable:$true] %s15_s10  ;;  %s25_s12 = int_to_ptr.vmem [resolvable:$true] %s24_s12 }
   0x3   :  { %s344_s13 = scalar_lea.vmem %s16_s10, 128  ;;  %p349_p1 = scmp.lt.s32.totalorder %s16_s10, %s16_s10 }
   0x4   :  { %p345_p0 = scmp.ne.s32.totalorder %s16_s10, %s344_s13  ;;  %p350_p2 = scmp.lt.s32.totalorder %s344_s13, %s344_s13 }
   0x6   :  { %p351_p3 = por %p350_p2, %p349_p1 }
   0x8   :  { %p352_p4 = pnand %p351_p3, %p345_p0 }
   0xa   :  { %355 = shalt.err (!%p352_p4)
}
   0xb   :  { %18 = dma.hbm_to_vmem [thread:$0]  %s412_s0, 128, %s16_s10, [#allocation3]  }
   0xc   :  { %s364_s16 = scalar_lea.vmem %s25_s12, 2432  ;;  %p369_p6 = scmp.lt.s32.totalorder %s25_s12, %s25_s12 }
   0xd   :  { %p365_p5 = scmp.ne.s32.totalorder %s25_s12, %s364_s16  ;;  %p370_p7 = scmp.lt.s32.totalorder %s364_s16, %s364_s16 }
   0xf   :  { %p371_p8 = por %p370_p7, %p369_p6 }
  0x11   :  { %p372_p9 = pnand %p371_p8, %p365_p5 }
  0x13   :  { %375 = shalt.err (!%p372_p9)
}
  0x14   :  { %s382_s17 = smov 128   ;;  %s383_s18 = smov 8  }
  0x15   :  { %30 = dma.hbm_to_vmem [thread:$0]  %s413_s1, 2432, %s25_s12, [#allocation5], %s382_s17, %s382_s17, %s383_s18  }
  0x16   :  { %376 = dma.done.wait [#allocation3], 128  }
  0x17   :  { %377 = vsyncadd [#allocation3], 4294967168 }
  0x18   :  { %378 = dma.done.wait [#allocation5], 2432  }
  0x19   :  { %379 = vsyncadd [#allocation5], 4294964864  ;;  %v384_v0 = vmov 0.0   ;;  %vm385_vm0 = vmmov 0   ;;  %vm44_vm1 = vcmask 64512   ;;  %v38_v1 = vld [vmem:[#allocation4] sm:$0xff]  ;;  %v210_v24 = vlaneseq }
  0x1a   :  { %286 = vmatprep.subr.mxu0 %v384_v0  ;;  %288 = vmatprep.mubr.msk.f32.mxu0 %vm385_vm0, %v384_v0  ;;  %v37_v2 = vld [vmem:[#allocation2] sm:$0xff]  ;;  %v134_v3 = vld [vmem:[#allocation4 + $0x88] sm:$0xff]  ;;  %v133_v4 = vld [vmem:[#allocation4 + $0x80] sm:$0xff] }
  0x1b   :  { %291 = vmatprep.subr.mxu1 %v384_v0  ;;  %323 = vmatprep.mubr.msk.f32.mxu1 %vm385_vm0, %v384_v0  ;;  %v132_v5 = vld [vmem:[#allocation4 + $0x78] sm:$0xff]  ;;  %v131_v6 = vld [vmem:[#allocation4 + $0x70] sm:$0xff]  ;;  %v130_v7 = vld [vmem:[#allocation4 + $0x68] sm:$0xff]  ;;  %v211_v25 = vand.u32 127, %v210_v24 }
  0x1c   :  { %287 = vmatpush3.msra.mxu0 %v38_v1  ;;  %292 = vmatpush3.msra.mxu1 %v134_v3  ;;  %v129_v8 = vld [vmem:[#allocation4 + $0x60] sm:$0xff]  ;;  %v128_v9 = vld [vmem:[#allocation4 + $0x58] sm:$0xff]  ;;  %v127_v10 = vld [vmem:[#allocation4 + $0x50] sm:$0xff] }
  0x1d   :  { %289 = vmatmul.mubr.msk.f32.vlgmr.msra.gmra.mxu0 %vm44_vm1, %v37_v2  ;;  %293 = vmatprep.subr.mxu1 %v384_v0  ;;  %v126_v11 = vld [vmem:[#allocation4 + $0x48] sm:$0xff]  ;;  %v125_v12 = vld [vmem:[#allocation4 + $0x40] sm:$0xff]  ;;  %v124_v13 = vld [vmem:[#allocation4 + $0x38] sm:$0xff]  ;;  %vm212_vm2 = vcmp.lt.s32.totalorder %v211_v25, 4  ;;  %vm223_vm3 = vcmp.eq.s32.totalorder %v211_v25, 4 }
  0x1e   :  { %294 = vmatpush3.msra.mxu1 %v133_v4  ;;  %v123_v14 = vld [vmem:[#allocation4 + $0x30] sm:$0xff]  ;;  %v122_v15 = vld [vmem:[#allocation4 + $0x28] sm:$0xff]  ;;  %v121_v16 = vld [vmem:[#allocation4 + $0x20] sm:$0xff] }
  0x1f   :  { %295 = vmatprep.subr.mxu1 %v384_v0  ;;  %v120_v17 = vld [vmem:[#allocation4 + $0x18] sm:$0xff]  ;;  %v119_v18 = vld [vmem:[#allocation4 + $0x10] sm:$0xff]  ;;  %v264_v19 = vld [vmem:[#allocation4 + $0x8] ss:$0 sm:$0xff] }
  0x20   :  { %296 = vmatpush3.msra.mxu1 %v132_v5  ;;  %v266_v26 = vld [vmem:[#allocation4 + $0x90] ss:$0 sm:$0xff] }
  0x21   :  { %297 = vmatprep.subr.mxu1 %v384_v0 }
  0x22   :  { %298 = vmatpush3.msra.mxu1 %v131_v6 }
  0x23   :  { %299 = vmatprep.subr.mxu1 %v384_v0 }
  0x24   :  { %300 = vmatpush3.msra.mxu1 %v130_v7 }
  0x25   :  { %301 = vmatprep.subr.mxu1 %v384_v0 }
  0x26   :  { %302 = vmatpush3.msra.mxu1 %v129_v8 }
  0x27   :  { %303 = vmatprep.subr.mxu1 %v384_v0 }
  0x28   :  { %304 = vmatpush3.msra.mxu1 %v128_v9 }
  0x29   :  { %305 = vmatprep.subr.mxu1 %v384_v0 }
  0x2a   :  { %306 = vmatpush3.msra.mxu1 %v127_v10 }
  0x2b   :  { %307 = vmatprep.subr.mxu1 %v384_v0 }
  0x2c   :  { %308 = vmatpush3.msra.mxu1 %v126_v11 }
  0x2d   :  { %309 = vmatprep.subr.mxu1 %v384_v0 }
  0x2e   :  { %310 = vmatpush3.msra.mxu1 %v125_v12 }
  0x2f   :  { %311 = vmatprep.subr.mxu1 %v384_v0 }
  0x30   :  { %312 = vmatpush3.msra.mxu1 %v124_v13 }
  0x31   :  { %313 = vmatprep.subr.mxu1 %v384_v0 }
  0x32   :  { %314 = vmatpush3.msra.mxu1 %v123_v14 }
  0x33   :  { %315 = vmatprep.subr.mxu1 %v384_v0 }
  0x34   :  { %316 = vmatpush3.msra.mxu1 %v122_v15 }
  0x35   :  { %317 = vmatprep.subr.mxu1 %v384_v0 }
  0x36   :  { %318 = vmatpush3.msra.mxu1 %v121_v16 }
  0x37   :  { %319 = vmatprep.subr.mxu1 %v384_v0 }
  0x38   :  { %320 = vmatpush3.msra.mxu1 %v120_v17 }
  0x39   :  { %321 = vmatprep.subr.mxu1 %v384_v0 }
  0x3a   :  { %322 = vmatpush3.msra.mxu1 %v119_v18 }
  0xdd   :  { %v114_v20 = vpop.f32.mrf.mxu0 }
  0xde   :  { %v115_v21 = vadd.f32 %v264_v19, %v114_v20 }
  0xdf   :  { %v290_v22 = vpop.f32.mrf.mxu0 }
  0xe0   :  { %v118_v23 = vmax.f32 %v115_v21, 0.0 }
  0xe2   :  { %324 = vmatmul.mubr.f32.vlgmr.msra.gmra.mxu1 %v118_v23 }
 0x1a2   :  { %v206_v27 = vpop.f32.mrf.mxu1 }
 0x1a3   :  { %v207_v28 = vadd.f32 %v266_v26, %v206_v27 }
 0x1a4   :  { %v325_v29 = vpop.f32.mrf.mxu1 }
 0x1a5   :  { %v213_v30 = vsel %vm212_vm2, %v207_v28, -1e+30 }
 0x1a6   :  { %214 = vmax.xlane.f32.xlu0 %v213_v30 }
 0x22f   :  { %v215_v31 = vpop.xlane.xlu0 %214 }
 0x230   :  { %v216_v32 = vsub.f32 %v213_v30, %v215_v31 }
 0x232   :  { %v217_v33 = vmul.f32 1.442695, %v216_v32 }
 0x234   :  { %332 = vpow2.f32 %v217_v33 }
 0x241   :  { %v333_v34 = vpop.eup %332 }
 0x242   :  { %219 = vadd.xlane.f32.xlu0 %v333_v34 }
 0x2cb   :  { %v220_v35 = vpop.xlane.xlu0 %219 }
 0x2cc   :  { %334 = vrcp.f32 %v220_v35 }
 0x2d9   :  { %v335_v36 = vpop.eup %334 }
 0x2da   :  { %v222_v37 = vmul.f32 %v335_v36, %v333_v34 }
 0x2dc   :  { %v224_v38 = vsel %vm223_vm3, %v207_v28, %v222_v37 }
 0x2dd   :  { %225 = vxpose.xlu1.b32.start.end [1/1] (short) (narrow) %v224_v38, 8 }
 0x359   :  { %v241_v39 = vpop.trf.xlu1 }
 0x35a   :  { %257 = vst.msk [vmem:[%s414_s2] sm:$0xff] %vm44_vm1, %v241_v39 }
 0x35b   :  { %262 = vsyncpa [#allocation3], 1 }
 0x35c   :  { %263 = vsyncpa [#allocation5], 1 }

</bundles_post_ra>
